<compile_context>
chip_gen: v7x
topology: tpu7x:2x2x1
jax: 0.10.0
libtpu: 0.0.40
codegen_flags: <defaults>
</compile_context>

<pallas_src>
import jax
import jax.numpy as jnp
from jax.experimental import pallas as pl
from jax.experimental.pallas import tpu as pltpu

NEG_SLOPE = 0.01   # nn.LeakyReLU() default negative_slope
TARGET = 1         # forward() uses x[:, 1, :]
C_PAD = 128        # lane-dense output padding (true C=3 sliced out in the wrapper)


def mlp_head_kernel(x_ref, w1_ref, b1_ref, w2_ref, b2_ref, o_ref):
    # x_ref: [block_b, H] bf16 (target sentence already selected in the wrapper)
    # fc1: bf16 x bf16 -> f32 accumulate, + f32 bias
    h = jnp.dot(x_ref[...], w1_ref[...],
                preferred_element_type=jnp.float32) + b1_ref[...]
    # LeakyReLU
    h = jnp.where(h > 0, h, NEG_SLOPE * h)
    # (dropout == identity in eval mode)
    # fc2: bf16 x bf16 -> f32 accumulate, + f32 bias (lane-padded to C_PAD)
    y = jnp.dot(h.astype(jnp.bfloat16), w2_ref[...],
                preferred_element_type=jnp.float32) + b2_ref[...]
    o_ref[...] = y.astype(o_ref.dtype)


def network0_forward(x, w1, b1, w2, b2, *, block_b=8):
    B, L, H = x.shape
    H1 = w1.shape[1]
    C = w2.shape[1]

    # Sentence-select + cast hoisted out of the kernel: only the target row is DMA'd.
    x_t = x[:, TARGET, :].astype(jnp.bfloat16)            # [B, H] bf16

    # Pad batch (M dim) to a multiple of block_b (>= 8 sublanes).
    B_pad = ((B + block_b - 1) // block_b) * block_b
    if B_pad != B:
        x_t = jnp.pad(x_t, ((0, B_pad - B), (0, 0)))
    n_blocks = B_pad // block_b

    # bf16 weights; fc2 weight/bias zero-padded on the output-channel (lane) dim.
    w1_bf = w1.astype(jnp.bfloat16)
    b1_f = b1.astype(jnp.float32)
    w2_p = jnp.zeros((H1, C_PAD), jnp.bfloat16).at[:, :C].set(w2.astype(jnp.bfloat16))
    b2_p = jnp.zeros((1, C_PAD), jnp.float32).at[:, :C].set(b2.astype(jnp.float32))

    out = pl.pallas_call(
        mlp_head_kernel,
        out_shape=jax.ShapeDtypeStruct((B_pad, C_PAD), jnp.float32),
        grid=(n_blocks,),
        in_specs=[
            # per-step batch tile; weights use constant index_maps -> fetched once,
            # VMEM-resident across all grid steps.
            pl.BlockSpec((block_b, H), lambda i: (i, 0)),    # x tile [block_b, 768]
            pl.BlockSpec((H, H1), lambda i: (0, 0)),         # fc1 weight [768, 192] bf16
            pl.BlockSpec((1, H1), lambda i: (0, 0)),         # fc1 bias
            pl.BlockSpec((H1, C_PAD), lambda i: (0, 0)),     # fc2 weight [192, 128] bf16
            pl.BlockSpec((1, C_PAD), lambda i: (0, 0)),      # fc2 bias
        ],
        out_specs=pl.BlockSpec((block_b, C_PAD), lambda i: (i, 0)),
        compiler_params=pltpu.CompilerParams(
            dimension_semantics=("parallel",)),              # batch axis shards across TCs (v7x)
    )(x_t, w1_bf, b1_f, w2_p, b2_p)

    return out[:B, :C]


if __name__ == "__main__":
    B, L, H, H1, C = 4, 3, 768, 192, 3   # batch_size=4, L=3, hidden=768, fc1=192, fc2=3

    key = jax.random.PRNGKey(0)
    kx, k1, k2, k3, k4 = jax.random.split(key, 5)

    # Deterministic "pooled BERT features" input and MLP parameters.
    x = jax.random.normal(kx, (B, L, H), dtype=jnp.float32)
    w1 = jax.random.normal(k1, (H, H1), dtype=jnp.float32) * 0.02
    b1 = jax.random.normal(k2, (1, H1), dtype=jnp.float32) * 0.02
    w2 = jax.random.normal(k3, (H1, C), dtype=jnp.float32) * 0.02
    b2 = jax.random.normal(k4, (1, C), dtype=jnp.float32) * 0.02

    out = network0_forward(x, w1, b1, w2, b2)
    jax.block_until_ready(out)

    # Pure-JAX f32 reference (fc1 -> LeakyReLU -> fc2 on the target sentence).
    # Tolerance relaxed because the kernel uses bf16 operands (f32 accumulation).
    xt = x[:, TARGET, :]
    h_ref = xt @ w1 + b1
    h_ref = jnp.where(h_ref > 0, h_ref, NEG_SLOPE * h_ref)
    ref = h_ref @ w2 + b2
    assert out.shape == (B, C)
    assert jnp.allclose(out, ref, atol=2e-2, rtol=2e-2), "mismatch vs reference"

    print("KERNEL_OK")
</pallas_src>

<mosaic_0001>
module attributes {stable_mosaic.version = 11 : i64} {
  func.func @mlp_head_kernel(%arg0: i32, %arg1: memref<8x768xbf16, #tpu.memory_space<vmem>>, %arg2: memref<768x192xbf16, #tpu.memory_space<vmem>>, %arg3: memref<1x192xf32, #tpu.memory_space<vmem>>, %arg4: memref<192x128xbf16, #tpu.memory_space<vmem>>, %arg5: memref<1x128xf32, #tpu.memory_space<vmem>>, %arg6: memref<8x128xf32, #tpu.memory_space<vmem>>) attributes {dimension_semantics = [#tpu.dimension_semantics<parallel>], iteration_bounds = array<i64: 1>, scalar_prefetch = 0 : i64, scratch_operands = 0 : i64, tpu.core_type = #tpu.core_type<tc>, window_params = [{transform_indices = @transform_0, window_bounds = array<i64: 8, 768>}, {pipeline_mode = #tpu.pipeline_mode<synchronous>, transform_indices = @transform_1, window_bounds = array<i64: 768, 192>}, {pipeline_mode = #tpu.pipeline_mode<synchronous>, transform_indices = @transform_2, window_bounds = array<i64: 1, 192>}, {pipeline_mode = #tpu.pipeline_mode<synchronous>, transform_indices = @transform_3, window_bounds = array<i64: 192, 128>}, {pipeline_mode = #tpu.pipeline_mode<synchronous>, transform_indices = @transform_4, window_bounds = array<i64: 1, 128>}, {transform_indices = @transform_5, window_bounds = array<i64: 8, 128>}]} {
    %c0 = arith.constant 0 : index
    %c0_0 = arith.constant 0 : index
    %0 = vector.load %arg1[%c0, %c0_0] : memref<8x768xbf16, #tpu.memory_space<vmem>>, vector<8x768xbf16>
    %c0_1 = arith.constant 0 : index
    %c0_2 = arith.constant 0 : index
    %1 = vector.load %arg2[%c0_1, %c0_2] : memref<768x192xbf16, #tpu.memory_space<vmem>>, vector<768x192xbf16>
    %cst = arith.constant dense<0.000000e+00> : vector<8x192xf32>
    %2 = tpu.matmul %0, %1, %cst {dimension_numbers = #tpu.dot_dimension_numbers<[1], [0], [0], [1], [0, 0, 1, 1], [], []>} : vector<8x768xbf16>, vector<768x192xbf16>, vector<8x192xf32> -> vector<8x192xf32>
    %c0_3 = arith.constant 0 : index
    %c0_4 = arith.constant 0 : index
    %3 = vector.load %arg3[%c0_3, %c0_4] : memref<1x192xf32, #tpu.memory_space<vmem>>, vector<1x192xf32>
    %4 = vector.broadcast %3 : vector<1x192xf32> to vector<8x192xf32>
    %5 = arith.addf %2, %4 : vector<8x192xf32>
    %cst_5 = arith.constant 0.000000e+00 : f32
    %6 = vector.broadcast %cst_5 : f32 to vector<8x192xf32>
    %7 = arith.cmpf ogt, %5, %6 : vector<8x192xf32>
    %cst_6 = arith.constant 0.00999999977 : f32
    %8 = vector.broadcast %cst_6 : f32 to vector<8x192xf32>
    %9 = arith.mulf %8, %5 : vector<8x192xf32>
    %10 = arith.select %7, %5, %9 : vector<8x192xi1>, vector<8x192xf32>
    %11 = arith.truncf %10 : vector<8x192xf32> to vector<8x192xbf16>
    %c0_7 = arith.constant 0 : index
    %c0_8 = arith.constant 0 : index
    %12 = vector.load %arg4[%c0_7, %c0_8] : memref<192x128xbf16, #tpu.memory_space<vmem>>, vector<192x128xbf16>
    %cst_9 = arith.constant dense<0.000000e+00> : vector<8x128xf32>
    %13 = tpu.matmul %11, %12, %cst_9 {dimension_numbers = #tpu.dot_dimension_numbers<[1], [0], [0], [1], [0, 0, 1, 1], [], []>} : vector<8x192xbf16>, vector<192x128xbf16>, vector<8x128xf32> -> vector<8x128xf32>
    %c0_10 = arith.constant 0 : index
    %c0_11 = arith.constant 0 : index
    %14 = vector.load %arg5[%c0_10, %c0_11] : memref<1x128xf32, #tpu.memory_space<vmem>>, vector<1x128xf32>
    %15 = vector.broadcast %14 : vector<1x128xf32> to vector<8x128xf32>
    %16 = arith.addf %13, %15 : vector<8x128xf32>
    %c0_12 = arith.constant 0 : index
    %c0_13 = arith.constant 0 : index
    %17 = vector.load %arg6[%c0_12, %c0_13] : memref<8x128xf32, #tpu.memory_space<vmem>>, vector<8x128xf32>
    tpu.vector_store %arg6[%c0_12, %c0_13], %16 {strides = array<i32>} : memref<8x128xf32, #tpu.memory_space<vmem>>, vector<8x128xf32>,
    return
  }
  func.func @transform_0(%arg0: i32) -> (i32, i32) {
    %c0_i32 = arith.constant 0 : i32
    %c0_i32_0 = arith.constant 0 : i32
    return %arg0, %c0_i32 : i32, i32
  }
  func.func @transform_1(%arg0: i32) -> (i32, i32) {
    %c0_i32 = arith.constant 0 : i32
    %c0_i32_0 = arith.constant 0 : i32
    %c0_i32_1 = arith.constant 0 : i32
    return %c0_i32, %c0_i32_0 : i32, i32
  }
  func.func @transform_2(%arg0: i32) -> (i32, i32) {
    %c0_i32 = arith.constant 0 : i32
    %c0_i32_0 = arith.constant 0 : i32
    %c0_i32_1 = arith.constant 0 : i32
    return %c0_i32, %c0_i32_0 : i32, i32
  }
  func.func @transform_3(%arg0: i32) -> (i32, i32) {
    %c0_i32 = arith.constant 0 : i32
    %c0_i32_0 = arith.constant 0 : i32
    %c0_i32_1 = arith.constant 0 : i32
    return %c0_i32, %c0_i32_0 : i32, i32
  }
  func.func @transform_4(%arg0: i32) -> (i32, i32) {
    %c0_i32 = arith.constant 0 : i32
    %c0_i32_0 = arith.constant 0 : i32
    %c0_i32_1 = arith.constant 0 : i32
    return %c0_i32, %c0_i32_0 : i32, i32
  }
  func.func @transform_5(%arg0: i32) -> (i32, i32) {
    %c0_i32 = arith.constant 0 : i32
    %c0_i32_0 = arith.constant 0 : i32
    return %arg0, %c0_i32 : i32, i32
  }
}

</mosaic_0001>

<bundles_post_ra>
// kernel: tpu_custom_call.1
= control target key start
LH: loop header
LB: loop body
LE: loop exit
PB: predicated region body
PF: predicated region fallthrough
CT: control target
= control target key end

     0   :  { %s1646_s0 = inlined_call_operand.vmem [shape: bf16[8,768], index: 0, kind: input, shape index: {}]   ;;  %s1647_s1 = inlined_call_operand.vmem [shape: bf16[768,192], index: 1, kind: input, shape index: {}]   ;;  %s1648_s2 = inlined_call_operand.vmem [shape: f32[1,192], index: 2, kind: input, shape index: {}]   ;;  %s1649_s3 = inlined_call_operand.vmem [shape: bf16[192,128], index: 3, kind: input, shape index: {}]   ;;  %s1650_s4 = inlined_call_operand.vmem [shape: f32[1,128], index: 4, kind: input, shape index: {}]   ;;  %s1651_s5 = inlined_call_operand.hbm [shape: f32[8,128], index: 5, kind: output, shape index: {}]  }
   0x1   :  { %v1053_v0 = vld [vmem:[%s1647_s1 + $0x104] ss:$8 sps:$4 sm:$0xff]   ;;  %v1055_v1 = vld [vmem:[%s1647_s1 + $0x100] ss:$8 sps:$4 sm:$0xff]   ;;  %v1056_v2 = vld [vmem:[%s1647_s1 + $0x114] ss:$8 sps:$4 sm:$0xff]  }
   0x2   :  { %675 = vmatprep.subr.bf16.mxu0 %v1053_v0  ;;  %v1058_v3 = vld [vmem:[%s1647_s1 + $0x110] ss:$8 sps:$4 sm:$0xff]   ;;  %v1059_v4 = vld [vmem:[%s1647_s1 + $0x124] ss:$8 sps:$4 sm:$0xff]   ;;  %v1061_v5 = vld [vmem:[%s1647_s1 + $0x120] ss:$8 sps:$4 sm:$0xff]  }
   0x3   :  { %676 = vmatpush1.bf16.msra.mxu0 %v1055_v1  ;;  %v1062_v6 = vld [vmem:[%s1647_s1 + $0x134] ss:$8 sps:$4 sm:$0xff]   ;;  %v1064_v7 = vld [vmem:[%s1647_s1 + $0x130] ss:$8 sps:$4 sm:$0xff]   ;;  %v1065_v8 = vld [vmem:[%s1647_s1 + $0x144] ss:$8 sps:$4 sm:$0xff]  }
   0x4   :  { %677 = vmatprep.subr.bf16.mxu0 %v1056_v2  ;;  %v1067_v9 = vld [vmem:[%s1647_s1 + $0x140] ss:$8 sps:$4 sm:$0xff]   ;;  %v1068_v10 = vld [vmem:[%s1647_s1 + $0x154] ss:$8 sps:$4 sm:$0xff]   ;;  %v1070_v11 = vld [vmem:[%s1647_s1 + $0x150] ss:$8 sps:$4 sm:$0xff]  }
   0x5   :  { %v1071_v12 = vld [vmem:[%s1647_s1 + $0x164] ss:$8 sps:$4 sm:$0xff]   ;;  %v1100_v14 = vld [vmem:[%s1647_s1] ss:$8 sps:$4 sm:$0xff]   ;;  %v1074_v16 = vld [vmem:[%s1647_s1 + $0x174] ss:$8 sps:$4 sm:$0xff]  }
   0x6   :  { %v1098_v13 = vld [vmem:[%s1647_s1 + $0x4] ss:$8 sps:$4 sm:$0xff]   ;;  %v1073_v15 = vld [vmem:[%s1647_s1 + $0x160] ss:$8 sps:$4 sm:$0xff]   ;;  %v1104_v17 = vld [vmem:[%s1647_s1 + $0x14] ss:$8 sps:$4 sm:$0xff]  }
   0x7   :  { %678 = vmatpush1.bf16.msra.mxu0 %v1058_v3  ;;  %634 = vmatprep.subr.bf16.mxu1 %v1098_v13  ;;  %v1106_v18 = vld [vmem:[%s1647_s1 + $0x10] ss:$8 sps:$4 sm:$0xff]   ;;  %v1331_v19 = vld [vmem:[%s1646_s0 + $0x8] sm:$0xff]  ;;  %v1118_v25 = vld [vmem:[%s1647_s1 + $0x34] ss:$8 sps:$4 sm:$0xff]  }
   0x8   :  { %679 = vmatprep.subr.bf16.mxu0 %v1059_v4  ;;  %635 = vmatpush1.bf16.msra.mxu1 %v1100_v14  ;;  %v930_v20 = vcombine.high %v1331_v19, %v1331_v19  ;;  %v1076_v21 = vld [vmem:[%s1647_s1 + $0x170] ss:$8 sps:$4 sm:$0xff]   ;;  %v1112_v22 = vld [vmem:[%s1647_s1 + $0x24] ss:$8 sps:$4 sm:$0xff]   ;;  %v1114_v23 = vld [vmem:[%s1647_s1 + $0x20] ss:$8 sps:$4 sm:$0xff]   ;;  %v929_v58 = vcombine.low %v1331_v19, %v1331_v19 }
   0x9   :  { %636 = vmatprep.subr.bf16.mxu1 %v1104_v17  ;;  %v1077_v24 = vld [vmem:[%s1647_s1 + $0x184] ss:$8 sps:$4 sm:$0xff]   ;;  %v1079_v26 = vld [vmem:[%s1647_s1 + $0x180] ss:$8 sps:$4 sm:$0xff]   ;;  %v1080_v27 = vld [vmem:[%s1647_s1 + $0x194] ss:$8 sps:$4 sm:$0xff]  }
   0xa   :  { %707 = vmatprep.mubr.bf16.mxu0 %v930_v20  ;;  %v1120_v28 = vld [vmem:[%s1647_s1 + $0x30] ss:$8 sps:$4 sm:$0xff]   ;;  %v1124_v29 = vld [vmem:[%s1647_s1 + $0x44] ss:$8 sps:$4 sm:$0xff]   ;;  %v1126_v32 = vld [vmem:[%s1647_s1 + $0x40] ss:$8 sps:$4 sm:$0xff]  }
   0xb   :  { %680 = vmatpush1.bf16.msra.mxu0 %v1061_v5  ;;  %v1082_v30 = vld [vmem:[%s1647_s1 + $0x190] ss:$8 sps:$4 sm:$0xff]   ;;  %v1083_v31 = vld [vmem:[%s1647_s1 + $0x1a4] ss:$8 sps:$4 sm:$0xff]   ;;  %v1130_v33 = vld [vmem:[%s1647_s1 + $0x54] ss:$8 sps:$4 sm:$0xff]  }
   0xc   :  { %681 = vmatprep.subr.bf16.mxu0 %v1062_v6  ;;  %637 = vmatpush1.bf16.msra.mxu1 %v1106_v18  ;;  %v1085_v34 = vld [vmem:[%s1647_s1 + $0x1a0] ss:$8 sps:$4 sm:$0xff]   ;;  %v1086_v35 = vld [vmem:[%s1647_s1 + $0x1b4] ss:$8 sps:$4 sm:$0xff]   ;;  %v1132_v36 = vld [vmem:[%s1647_s1 + $0x50] ss:$8 sps:$4 sm:$0xff]  }
   0xd   :  { %638 = vmatprep.subr.bf16.mxu1 %v1112_v22  ;;  %v1136_v37 = vld [vmem:[%s1647_s1 + $0x64] ss:$8 sps:$4 sm:$0xff]   ;;  %v1088_v38 = vld [vmem:[%s1647_s1 + $0x1b0] ss:$8 sps:$4 sm:$0xff]   ;;  %v1138_v40 = vld [vmem:[%s1647_s1 + $0x60] ss:$8 sps:$4 sm:$0xff]  }
   0xe   :  { %v1089_v39 = vld [vmem:[%s1647_s1 + $0x1c4] ss:$8 sps:$4 sm:$0xff]   ;;  %v1142_v41 = vld [vmem:[%s1647_s1 + $0x74] ss:$8 sps:$4 sm:$0xff]   ;;  %v1091_v42 = vld [vmem:[%s1647_s1 + $0x1c0] ss:$8 sps:$4 sm:$0xff]  }
   0xf   :  { %682 = vmatpush1.bf16.msra.mxu0 %v1064_v7  ;;  %v1092_v43 = vld [vmem:[%s1647_s1 + $0x1d4] ss:$8 sps:$4 sm:$0xff]   ;;  %v1144_v44 = vld [vmem:[%s1647_s1 + $0x70] ss:$8 sps:$4 sm:$0xff]   ;;  %v1148_v45 = vld [vmem:[%s1647_s1 + $0x84] ss:$8 sps:$4 sm:$0xff]  }
  0x10   :  { %683 = vmatprep.subr.bf16.mxu0 %v1065_v8  ;;  %639 = vmatpush1.bf16.msra.mxu1 %v1114_v23  ;;  %v1094_v46 = vld [vmem:[%s1647_s1 + $0x1d0] ss:$8 sps:$4 sm:$0xff]   ;;  %v1095_v47 = vld [vmem:[%s1647_s1 + $0x1e4] ss:$8 sps:$4 sm:$0xff]   ;;  %v1150_v48 = vld [vmem:[%s1647_s1 + $0x80] ss:$8 sps:$4 sm:$0xff]  }
  0x11   :  { %640 = vmatprep.subr.bf16.mxu1 %v1118_v25  ;;  %v1154_v49 = vld [vmem:[%s1647_s1 + $0x94] ss:$8 sps:$4 sm:$0xff]   ;;  %v1097_v50 = vld [vmem:[%s1647_s1 + $0x1e0] ss:$8 sps:$4 sm:$0xff]   ;;  %v1156_v52 = vld [vmem:[%s1647_s1 + $0x90] ss:$8 sps:$4 sm:$0xff]  }
  0x12   :  { %v1101_v51 = vld [vmem:[%s1647_s1 + $0x1f4] ss:$8 sps:$4 sm:$0xff]   ;;  %v1160_v53 = vld [vmem:[%s1647_s1 + $0xa4] ss:$8 sps:$4 sm:$0xff]   ;;  %v1103_v54 = vld [vmem:[%s1647_s1 + $0x1f0] ss:$8 sps:$4 sm:$0xff]  }
  0x13   :  { %684 = vmatpush1.bf16.msra.mxu0 %v1067_v9  ;;  %v1111_v55 = vld [vmem:[%s1647_s1 + $0x204] ss:$8 sps:$4 sm:$0xff]   ;;  %v1162_v56 = vld [vmem:[%s1647_s1 + $0xa0] ss:$8 sps:$4 sm:$0xff]   ;;  %v1166_v57 = vld [vmem:[%s1647_s1 + $0xb4] ss:$8 sps:$4 sm:$0xff]  }
  0x14   :  { %685 = vmatprep.subr.bf16.mxu0 %v1068_v10  ;;  %641 = vmatpush1.bf16.msra.mxu1 %v1120_v28  ;;  %v1109_v59 = vld [vmem:[%s1647_s1 + $0x200] ss:$8 sps:$4 sm:$0xff]   ;;  %v1168_v60 = vld [vmem:[%s1647_s1 + $0xb0] ss:$8 sps:$4 sm:$0xff]   ;;  %v1117_v62 = vld [vmem:[%s1647_s1 + $0x214] ss:$8 sps:$4 sm:$0xff]  }
  0x15   :  { %642 = vmatprep.subr.bf16.mxu1 %v1124_v29  ;;  %v22_v61 = vld [vmem:[%s1646_s0] sm:$0xff]  ;;  %v1466_v1 = vld [vmem:[%s1646_s0 + $0x10] sm:$0xff] }
  0x16   :  { %v1172_v63 = vld [vmem:[%s1647_s1 + $0xc4] ss:$8 sps:$4 sm:$0xff]   ;;  %v928_v0 = vcombine.high %v22_v61, %v22_v61  ;;  %v1115_v2 = vld [vmem:[%s1647_s1 + $0x210] ss:$8 sps:$4 sm:$0xff]   ;;  %v932_v3 = vcombine.high %v1466_v1, %v1466_v1  ;;  %v1174_v5 = vld [vmem:[%s1647_s1 + $0xc0] ss:$8 sps:$4 sm:$0xff]  }
  0x17   :  { %686 = vmatpush1.bf16.msra.mxu0 %v1070_v11  ;;  %v1123_v4 = vld [vmem:[%s1647_s1 + $0x224] ss:$8 sps:$4 sm:$0xff]   ;;  %v1178_v6 = vld [vmem:[%s1647_s1 + $0xd4] ss:$8 sps:$4 sm:$0xff]   ;;  %v1121_v7 = vld [vmem:[%s1647_s1 + $0x220] ss:$8 sps:$4 sm:$0xff]  }
  0x18   :  { %687 = vmatprep.subr.bf16.mxu0 %v1071_v12  ;;  %643 = vmatpush1.bf16.msra.mxu1 %v1126_v32  ;;  %v1129_v8 = vld [vmem:[%s1647_s1 + $0x234] ss:$8 sps:$4 sm:$0xff]   ;;  %v1180_v9 = vld [vmem:[%s1647_s1 + $0xd0] ss:$8 sps:$4 sm:$0xff]   ;;  %v1184_v10 = vld [vmem:[%s1647_s1 + $0xe4] ss:$8 sps:$4 sm:$0xff]  }
  0x19   :  { %644 = vmatprep.subr.bf16.mxu1 %v1130_v33  ;;  %666 = vmatprep.mubr.bf16.mxu1 %v928_v0  ;;  %v1127_v11 = vld [vmem:[%s1647_s1 + $0x230] ss:$8 sps:$4 sm:$0xff]   ;;  %v1186_v12 = vld [vmem:[%s1647_s1 + $0xe0] ss:$8 sps:$4 sm:$0xff]   ;;  %v1135_v13 = vld [vmem:[%s1647_s1 + $0x244] ss:$8 sps:$4 sm:$0xff]  }
  0x1a   :  { %v1190_v14 = vld [vmem:[%s1647_s1 + $0xf4] ss:$8 sps:$4 sm:$0xff]  }
  0x1b   :  { %688 = vmatpush1.bf16.msra.mxu0 %v1073_v15 }
  0x1c   :  { %689 = vmatprep.subr.bf16.mxu0 %v1074_v16  ;;  %645 = vmatpush1.bf16.msra.mxu1 %v1132_v36 }
  0x1d   :  { %646 = vmatprep.subr.bf16.mxu1 %v1136_v37 }
  0x1f   :  { %690 = vmatpush1.bf16.msra.mxu0 %v1076_v21 }
  0x20   :  { %691 = vmatprep.subr.bf16.mxu0 %v1077_v24  ;;  %647 = vmatpush1.bf16.msra.mxu1 %v1138_v40 }
  0x21   :  { %648 = vmatprep.subr.bf16.mxu1 %v1142_v41 }
  0x23   :  { %692 = vmatpush1.bf16.msra.mxu0 %v1079_v26 }
  0x24   :  { %693 = vmatprep.subr.bf16.mxu0 %v1080_v27  ;;  %649 = vmatpush1.bf16.msra.mxu1 %v1144_v44 }
  0x25   :  { %650 = vmatprep.subr.bf16.mxu1 %v1148_v45 }
  0x27   :  { %694 = vmatpush1.bf16.msra.mxu0 %v1082_v30 }
  0x28   :  { %695 = vmatprep.subr.bf16.mxu0 %v1083_v31  ;;  %651 = vmatpush1.bf16.msra.mxu1 %v1150_v48 }
  0x29   :  { %652 = vmatprep.subr.bf16.mxu1 %v1154_v49 }
  0x2b   :  { %696 = vmatpush1.bf16.msra.mxu0 %v1085_v34 }
  0x2c   :  { %697 = vmatprep.subr.bf16.mxu0 %v1086_v35  ;;  %653 = vmatpush1.bf16.msra.mxu1 %v1156_v52 }
  0x2d   :  { %654 = vmatprep.subr.bf16.mxu1 %v1160_v53 }
  0x2f   :  { %698 = vmatpush1.bf16.msra.mxu0 %v1088_v38 }
  0x30   :  { %699 = vmatprep.subr.bf16.mxu0 %v1089_v39  ;;  %655 = vmatpush1.bf16.msra.mxu1 %v1162_v56 }
  0x31   :  { %656 = vmatprep.subr.bf16.mxu1 %v1166_v57 }
  0x33   :  { %700 = vmatpush1.bf16.msra.mxu0 %v1091_v42 }
  0x34   :  { %701 = vmatprep.subr.bf16.mxu0 %v1092_v43  ;;  %657 = vmatpush1.bf16.msra.mxu1 %v1168_v60 }
  0x35   :  { %658 = vmatprep.subr.bf16.mxu1 %v1172_v63 }
  0x37   :  { %702 = vmatpush1.bf16.msra.mxu0 %v1094_v46 }
  0x38   :  { %703 = vmatprep.subr.bf16.mxu0 %v1095_v47  ;;  %659 = vmatpush1.bf16.msra.mxu1 %v1174_v5 }
  0x39   :  { %660 = vmatprep.subr.bf16.mxu1 %v1178_v6 }
  0x3b   :  { %704 = vmatpush1.bf16.msra.mxu0 %v1097_v50 }
  0x3c   :  { %705 = vmatprep.subr.bf16.mxu0 %v1101_v51  ;;  %661 = vmatpush1.bf16.msra.mxu1 %v1180_v9 }
  0x3d   :  { %662 = vmatprep.subr.bf16.mxu1 %v1184_v10 }
  0x3f   :  { %706 = vmatpush1.bf16.msra.mxu0 %v1103_v54 }
  0x40   :  { %716 = vmatprep.subr.bf16.mxu0 %v1111_v55 }
  0x42   :  { %708 = vmatmul.mubr.bf16.vlgmr.msra.gmra.mrb[0].mxu0 %v929_v58 }
  0x43   :  { %717 = vmatpush1.bf16.msra.mxu0 %v1109_v59  ;;  %748 = vmatprep.mubr.bf16.mxu0 %v932_v3 }
  0x44   :  { %718 = vmatprep.subr.bf16.mxu0 %v1117_v62 }
  0x47   :  { %719 = vmatpush1.bf16.msra.mxu0 %v1115_v2 }
  0x48   :  { %720 = vmatprep.subr.bf16.mxu0 %v1123_v4 }
  0x4b   :  { %721 = vmatpush1.bf16.msra.mxu0 %v1121_v7 }
  0x4c   :  { %722 = vmatprep.subr.bf16.mxu0 %v1129_v8 }
  0x4d   :  { %10 = vsyncpa [#allocation3], 0  ;;  %v1133_v15 = vld [vmem:[%s1647_s1 + $0x240] ss:$8 sps:$4 sm:$0xff]   ;;  %663 = vmatpush1.bf16.msra.mxu1 %v1186_v12  ;;  %v1192_v16 = vld [vmem:[%s1647_s1 + $0xf0] ss:$8 sps:$4 sm:$0xff]   ;;  %v927_v18 = vcombine.low %v22_v61, %v22_v61  ;;  %v931_v49 = vcombine.low %v1466_v1, %v1466_v1  ;;  %v123_v58 = vlaneseq }
  0x4e   :  { %v1141_v17 = vld [vmem:[%s1647_s1 + $0x254] ss:$8 sps:$4 sm:$0xff]   ;;  %664 = vmatprep.subr.bf16.mxu1 %v1190_v14  ;;  %v1139_v19 = vld [vmem:[%s1647_s1 + $0x250] ss:$8 sps:$4 sm:$0xff]   ;;  %v1203_v20 = vld [vmem:[%s1649_s3] sm:$0xff]   ;;  %v1239_v22 = vmov 0  }
  0x4f   :  { %723 = vmatpush1.bf16.msra.mxu0 %v1127_v11  ;;  %v1147_v21 = vld [vmem:[%s1647_s1 + $0x264] ss:$8 sps:$4 sm:$0xff]   ;;  %v1145_v23 = vld [vmem:[%s1647_s1 + $0x260] ss:$8 sps:$4 sm:$0xff]   ;;  %v1153_v25 = vld [vmem:[%s1647_s1 + $0x274] ss:$8 sps:$4 sm:$0xff]  }
  0x50   :  { %724 = vmatprep.subr.bf16.mxu0 %v1135_v13  ;;  %v1204_v24 = vld [vmem:[%s1649_s3 + $0x8] sm:$0xff]   ;;  %v1151_v26 = vld [vmem:[%s1647_s1 + $0x270] ss:$8 sps:$4 sm:$0xff]   ;;  %v1165_v31 = vld [vmem:[%s1647_s1 + $0x294] ss:$8 sps:$4 sm:$0xff]   ;;  %v124_v59 = vshrl.u32 %v123_v58, 7 }
  0x51   :  { %665 = vmatpush1.bf16.msra.mxu1 %v1192_v16  ;;  %v1205_v27 = vld [vmem:[%s1649_s3 + $0x10] sm:$0xff]   ;;  %v1159_v28 = vld [vmem:[%s1647_s1 + $0x284] ss:$8 sps:$4 sm:$0xff]   ;;  %v1157_v29 = vld [vmem:[%s1647_s1 + $0x280] ss:$8 sps:$4 sm:$0xff]   ;;  %vm868_vm2 = vcmask 523264  }
  0x52   :  { %872 = vmatprep.subr.bf16.mxu1 %v1239_v22  ;;  %v1206_v30 = vld [vmem:[%s1649_s3 + $0x18] sm:$0xff]   ;;  %v1207_v33 = vld [vmem:[%s1649_s3 + $0x20] sm:$0xff]   ;;  %v1208_v36 = vld [vmem:[%s1649_s3 + $0x28] sm:$0xff]   ;;  %v125_v60 = vsub.s32 0, %v124_v59  ;;  %v129_v62 = vsub.s32 1, %v124_v59  ;;  %s1240_s12 = smov [#allocation2]  }
  0x53   :  { %725 = vmatpush1.bf16.msra.mxu0 %v1133_v15  ;;  %v1163_v32 = vld [vmem:[%s1647_s1 + $0x290] ss:$8 sps:$4 sm:$0xff]   ;;  %v1171_v34 = vld [vmem:[%s1647_s1 + $0x2a4] ss:$8 sps:$4 sm:$0xff]   ;;  %v1169_v35 = vld [vmem:[%s1647_s1 + $0x2a0] ss:$8 sps:$4 sm:$0xff]  }
  0x54   :  { %726 = vmatprep.subr.bf16.mxu0 %v1141_v17  ;;  %667 = vmatmul.mubr.bf16.vlgmr.msra.gmra.mrb[0].mxu1 %v927_v18  ;;  %v1177_v37 = vld [vmem:[%s1647_s1 + $0x2b4] ss:$8 sps:$4 sm:$0xff]   ;;  %v1175_v38 = vld [vmem:[%s1647_s1 + $0x2b0] ss:$8 sps:$4 sm:$0xff]   ;;  %v1183_v40 = vld [vmem:[%s1647_s1 + $0x2c4] ss:$8 sps:$4 sm:$0xff]  }
  0x55   :  { %873 = vmatpush1.bf16.msra.mxu1 %v1203_v20  ;;  %v1209_v39 = vld [vmem:[%s1649_s3 + $0x30] sm:$0xff]   ;;  %v1181_v41 = vld [vmem:[%s1647_s1 + $0x2c0] ss:$8 sps:$4 sm:$0xff]   ;;  %v1210_v42 = vld [vmem:[%s1649_s3 + $0x38] sm:$0xff]   ;;  %s919_s13 = sshll.u32 %s1240_s12, 4  ;;  %s920_s13 = int_to_ptr.vmem [resolvable:$true] %s919_s13 }
  0x56   :  { %874 = vmatprep.subr.bf16.mxu1 %v1239_v22  ;;  %v1189_v43 = vld [vmem:[%s1647_s1 + $0x2d4] ss:$8 sps:$4 sm:$0xff]   ;;  %v1187_v44 = vld [vmem:[%s1647_s1 + $0x2d0] ss:$8 sps:$4 sm:$0xff]   ;;  %v1195_v45 = vld [vmem:[%s1647_s1 + $0x2e4] ss:$8 sps:$4 sm:$0xff]   ;;  %p1220_p1 = scmp.lt.s32.totalorder %s920_s13, %s920_s13 }
  0x57   :  { %727 = vmatpush1.bf16.msra.mxu0 %v1139_v19  ;;  %v1193_v46 = vld [vmem:[%s1647_s1 + $0x2e0] ss:$8 sps:$4 sm:$0xff]   ;;  %v1200_v47 = vld [vmem:[%s1647_s1 + $0x2f4] ss:$8 sps:$4 sm:$0xff]   ;;  %v1198_v48 = vld [vmem:[%s1647_s1 + $0x2f0] ss:$8 sps:$4 sm:$0xff]  }
  0x58   :  { %728 = vmatprep.subr.bf16.mxu0 %v1147_v21  ;;  %v1211_v50 = vld [vmem:[%s1649_s3 + $0x40] sm:$0xff]   ;;  %v1212_v51 = vld [vmem:[%s1649_s3 + $0x48] sm:$0xff]   ;;  %v1213_v52 = vld [vmem:[%s1649_s3 + $0x50] sm:$0xff]   ;;  %s1215_s14 = scalar_lea.vmem %s920_s13, 128 }
  0x59   :  { %875 = vmatpush1.bf16.msra.mxu1 %v1204_v24  ;;  %v1214_v53 = vld [vmem:[%s1649_s3 + $0x58] sm:$0xff]   ;;  %v121_v61 = vld [vmem:[%s1648_s2] sm:$0x3]  ;;  %p1216_p0 = scmp.ne.s32.totalorder %s920_s13, %s1215_s14  ;;  %p1221_p2 = scmp.lt.s32.totalorder %s1215_s14, %s1215_s14 }
  0x5a   :  { %876 = vmatprep.subr.bf16.mxu1 %v1239_v22  ;;  %v126_v63 = vrot.slane %v121_v61, %v125_v60  ;;  %v130_v0 = vrot.slane %v121_v61, %v129_v62  ;;  %v1029_v15 = vld [vmem:[%s1650_s4] ss:$0 sm:$0xff] }
  0x5b   :  { %729 = vmatpush1.bf16.msra.mxu0 %v1145_v23  ;;  %p1222_p3 = por %p1221_p2, %p1220_p1 }
  0x5c   :  { %730 = vmatprep.subr.bf16.mxu0 %v1153_v25 }
  0x5d   :  { %877 = vmatpush1.bf16.msra.mxu1 %v1205_v27  ;;  %p1223_p4 = pnand %p1222_p3, %p1216_p0 }
  0x5e   :  { %878 = vmatprep.subr.bf16.mxu1 %v1239_v22 }
  0x5f   :  { %731 = vmatpush1.bf16.msra.mxu0 %v1151_v26 }
  0x60   :  { %732 = vmatprep.subr.bf16.mxu0 %v1159_v28 }
  0x61   :  { %879 = vmatpush1.bf16.msra.mxu1 %v1206_v30 }
  0x62   :  { %880 = vmatprep.subr.bf16.mxu1 %v1239_v22 }
  0x63   :  { %733 = vmatpush1.bf16.msra.mxu0 %v1157_v29 }
  0x64   :  { %734 = vmatprep.subr.bf16.mxu0 %v1165_v31 }
  0x65   :  { %881 = vmatpush1.bf16.msra.mxu1 %v1207_v33 }
  0x66   :  { %882 = vmatprep.subr.bf16.mxu1 %v1239_v22 }
  0x67   :  { %735 = vmatpush1.bf16.msra.mxu0 %v1163_v32 }
  0x68   :  { %736 = vmatprep.subr.bf16.mxu0 %v1171_v34 }
  0x69   :  { %883 = vmatpush1.bf16.msra.mxu1 %v1208_v36 }
  0x6a   :  { %884 = vmatprep.subr.bf16.mxu1 %v1239_v22 }
  0x6b   :  { %737 = vmatpush1.bf16.msra.mxu0 %v1169_v35 }
  0x6c   :  { %738 = vmatprep.subr.bf16.mxu0 %v1177_v37 }
  0x6d   :  { %885 = vmatpush1.bf16.msra.mxu1 %v1209_v39 }
  0x6e   :  { %886 = vmatprep.subr.bf16.mxu1 %v1239_v22 }
  0x6f   :  { %739 = vmatpush1.bf16.msra.mxu0 %v1175_v38 }
  0x70   :  { %740 = vmatprep.subr.bf16.mxu0 %v1183_v40 }
  0x71   :  { %887 = vmatpush1.bf16.msra.mxu1 %v1210_v42 }
  0x72   :  { %888 = vmatprep.subr.bf16.mxu1 %v1239_v22 }
  0x73   :  { %741 = vmatpush1.bf16.msra.mxu0 %v1181_v41 }
  0x74   :  { %742 = vmatprep.subr.bf16.mxu0 %v1189_v43 }
  0x75   :  { %889 = vmatpush1.bf16.msra.mxu1 %v1211_v50 }
  0x76   :  { %890 = vmatprep.subr.bf16.mxu1 %v1239_v22 }
  0x77   :  { %743 = vmatpush1.bf16.msra.mxu0 %v1187_v44 }
  0x78   :  { %744 = vmatprep.subr.bf16.mxu0 %v1195_v45 }
  0x79   :  { %891 = vmatpush1.bf16.msra.mxu1 %v1212_v51 }
  0x7a   :  { %892 = vmatprep.subr.bf16.mxu1 %v1239_v22 }
  0x7b   :  { %745 = vmatpush1.bf16.msra.mxu0 %v1193_v46 }
  0x7c   :  { %746 = vmatprep.subr.bf16.mxu0 %v1200_v47 }
  0x7d   :  { %893 = vmatpush1.bf16.msra.mxu1 %v1213_v52 }
  0x7e   :  { %894 = vmatprep.subr.bf16.mxu1 %v1239_v22 }
  0x7f   :  { %747 = vmatpush1.bf16.msra.mxu0 %v1198_v48 }
  0x81   :  { %895 = vmatpush1.bf16.msra.mxu1 %v1214_v53 }
  0x82   :  { %749 = vmatmul.mubr.bf16.vlgmr.msra.gmra.mrb[0].mxu0 %v931_v49 }
 0x127   :  { %v668_v54 = vpop.f32.mrb[0].mxu1 }
 0x128   :  { %v670_v55 = vpop.f32.mrb[1].mxu1  ;;  %v669_v1 = vadd.f32 %v668_v54, %v126_v63 }
 0x129   :  { %v672_v56 = vpop.f32.mrb[2].mxu1  ;;  %v671_v2 = vadd.f32 %v670_v55, %v130_v0 }
 0x12a   :  { %v673_v57 = vpop.f32.mrb[3].mxu1 }
 0x155   :  { %v750_v3 = vpop.f32.mrb[0].mxu0 }
 0x156   :  { %v1044_v4 = vadd.f32 %v750_v3, %v669_v1  ;;  %v752_v5 = vpop.f32.mrb[1].mxu0 }
 0x157   :  { %v1046_v6 = vadd.f32 %v752_v5, %v671_v2  ;;  %v754_v7 = vpop.f32.mrb[2].mxu0 }
 0x158   :  { %vm757_vm0 = vcmp.gt.f32.partialorder %v1044_v4, 0.0  ;;  %v759_v8 = vmul.f32 0.01, %v1044_v4  ;;  %v755_v9 = vpop.f32.mrb[3].mxu0 }
 0x159   :  { %vm758_vm1 = vcmp.gt.f32.partialorder %v1046_v6, 0.0  ;;  %v760_v10 = vmul.f32 0.01, %v1046_v6 }
 0x15a   :  { %v761_v11 = vsel %vm757_vm0, %v1044_v4, %v759_v8 }
 0x15b   :  { %v762_v12 = vsel %vm758_vm1, %v1046_v6, %v760_v10  ;;  %v763_v14 = vpack.c.bf16 %v761_v11, %v761_v11 }
 0x15c   :  { %v764_v13 = vpack.c.bf16 %v762_v12, %v762_v12 }
 0x15e   :  { %1042 = vmatprep.mubr.msk.bf16.mxu1 %vm868_vm2, %v764_v13 }
 0x15f   :  { %905 = vmatmul.mubr.bf16.vlgmr.msra.gmra.mrb[4].mxu1 %v763_v14 }
 0x232   :  { %v906_v16 = vpop.f32.mrb[4].mxu1 }
 0x233   :  { %v907_v17 = vadd.f32 %v1029_v15, %v906_v16  ;;  %v908_v18 = vpop.f32.mrb[5].mxu1 }
 0x234   :  { %v909_v19 = vpop.f32.mrb[6].mxu1 }
 0x235   :  { %912 = vst [vmem:[#allocation2] sm:$0xff] %v907_v17  ;;  %v910_v20 = vpop.f32.mrb[7].mxu1 }
 0x236   :  { %1226 = shalt.err (!%p1223_p4)
}
 0x237   :  { %s1227_s4 = scalar_lea.hbm %s1651_s5, 128 }
 0x238   :  { %p1228_p5 = scmp.ne.s32.totalorder %s1651_s5, %s1227_s4  ;;  %p1231_p6 = scmp.lt.u32.totalorder %s1227_s4, %s1651_s5 }
 0x23a   :  { %p1233_p7 = pnand %p1231_p6, %p1228_p5 }
 0x23c   :  { %1236 = shalt.err (!%p1233_p7)
}
 0x23d   :  { %922 = dma.vmem_to_hbm [thread:$0]  %s920_s13, 128, %s1651_s5, [#allocation3]  }
 0x23e   :  { %1237 = dma.done.wait [#allocation3], 128  }
 0x23f   :  { %1238 = vsyncadd [#allocation3], 4294967168 }
 0x240   :  { %926 = vsyncpa [#allocation3], 1 }

</bundles_post_ra>
